<compile_context>
chip_gen: v7x
topology: tpu7x:2x2x1
jax: 0.10.0
libtpu: 0.0.40
codegen_flags: <defaults>
</compile_context>

<pallas_src>
import jax
import jax.numpy as jnp
from jax.experimental import pallas as pl
from jax.experimental.pallas import tpu as pltpu


def channel_gate_kernel(x_ref, w1t_ref, b1_ref, w2t_ref, b2_ref, o_ref):
    # x_ref block: (1, C, HW) float32, HW on the lane axis.
    x = x_ref[0]                                         # (C, HW)

    # Spatial pooling: lane (XLU) reductions -> (C, 1) columns.
    avg = jnp.mean(x, axis=1, keepdims=True)             # (C, 1)
    mx = jnp.max(x, axis=1, keepdims=True)               # (C, 1)

    # Stack [avg | max] into one (C, 2) tile (column 0 = avg, column 1 = max)
    # so the shared MLP is a single pair of matmuls rather than two.
    C = x.shape[0]
    col = jax.lax.broadcasted_iota(jnp.int32, (C, 2), 1)
    pooled = jnp.where(col == 0, avg, mx)                # (C, 2)

    # Shared MLP on column vectors: h = relu(W1 @ p + b1); a = W2 @ h + b2.
    h = jnp.dot(w1t_ref[...], pooled,
                preferred_element_type=jnp.float32) + b1_ref[...]    # (Ch, 2)
    h = jnp.maximum(h, 0.0)                                          # ReLU
    a = jnp.dot(w2t_ref[...], h,
                preferred_element_type=jnp.float32) + b2_ref[...]    # (C, 2)

    # channel_att_sum = mlp(avg) + mlp(max)  ->  sum the two columns.
    att = jnp.sum(a, axis=1, keepdims=True)              # (C, 1)
    scale = jax.nn.sigmoid(att)                          # (C, 1)

    # Per-channel gate, broadcast over HW (lanes).  Lane-dense store.
    o_ref[0] = x * scale


def channel_gate(x_nchw, w1, b1, w2, b2):
    """x_nchw: (B, C, H, W) f32.  w1:(C,Ch), b1:(1,Ch), w2:(Ch,C), b2:(1,C)."""
    B, C, H, W = x_nchw.shape
    HW = H * W
    Ch = w1.shape[1]

    # Free reshape: merges contiguous trailing dims; no transpose / HBM pass.
    x_flat = x_nchw.reshape(B, C, HW)

    # Tiny parameter re-layouts so the kernel's MLP acts on column vectors.
    w1t = jnp.transpose(w1)          # (Ch, C)
    w2t = jnp.transpose(w2)          # (C, Ch)
    b1c = b1.reshape(Ch, 1)          # (Ch, 1)
    b2c = b2.reshape(C, 1)           # (C, 1)

    # VMEM budget: in + out blocks, double-buffered, plus slack.  Clamped to
    # 64 MiB so the request is valid on v7x as well as v5e/v6e.
    block_bytes = C * HW * 4
    vmem_limit = min(max(4 * block_bytes + (1 << 20), 16 << 20), 64 << 20)
    # TODO(synk): for very large C*HW (v7x's 64 MiB VMEM), split into a
    # pool+MLP kernel producing a (B, C) scale plus an HW-tiled elementwise
    # scale kernel instead of the single full-HW block per batch.

    out_flat = pl.pallas_call(
        channel_gate_kernel,
        out_shape=jax.ShapeDtypeStruct((B, C, HW), jnp.float32),
        grid_spec=pltpu.PrefetchScalarGridSpec(
            num_scalar_prefetch=0,
            grid=(B,),
            in_specs=[
                pl.BlockSpec((1, C, HW), lambda b: (b, 0, 0)),   # x (per batch)
                pl.BlockSpec((Ch, C), lambda b: (0, 0)),          # W1^T
                pl.BlockSpec((Ch, 1), lambda b: (0, 0)),          # b1 column
                pl.BlockSpec((C, Ch), lambda b: (0, 0)),          # W2^T
                pl.BlockSpec((C, 1), lambda b: (0, 0)),           # b2 column
            ],
            out_specs=pl.BlockSpec((1, C, HW), lambda b: (b, 0, 0)),
        ),
        compiler_params=pltpu.CompilerParams(
            dimension_semantics=("parallel",),
            vmem_limit_bytes=vmem_limit,
        ),
    )(x_flat, w1t, b1c, w2t, b2c)

    return out_flat.reshape(B, C, H, W)


def channel_gate_ref(x_nchw, w1, b1, w2, b2):
    """Pure-JAX reference mirroring the PyTorch forward."""
    avg = jnp.mean(x_nchw, axis=(2, 3))            # (B, C)
    mx = jnp.max(x_nchw, axis=(2, 3))              # (B, C)

    def mlp(p):
        h = jnp.maximum(p @ w1 + b1, 0.0)
        return h @ w2 + b2

    att = mlp(avg) + mlp(mx)
    scale = jax.nn.sigmoid(att)[:, :, None, None]
    return x_nchw * scale


if __name__ == "__main__":
    # gate_channels must be divisible by reduction_ratio=16 -> C=32, hidden=2.
    B, C, H, W = 2, 32, 16, 16
    r = 16
    Ch = C // r

    key = jax.random.PRNGKey(0)
    kx, k1, k2, k3, k4 = jax.random.split(key, 5)

    x = jax.random.normal(kx, (B, C, H, W), dtype=jnp.float32)

    # Deterministic synthetic parameters (Linear weights stored as (in, out)).
    w1 = jax.random.normal(k1, (C, Ch), dtype=jnp.float32) * (1.0 / jnp.sqrt(C))
    b1 = jax.random.normal(k2, (1, Ch), dtype=jnp.float32) * 0.1
    w2 = jax.random.normal(k3, (Ch, C), dtype=jnp.float32) * (1.0 / jnp.sqrt(Ch))
    b2 = jax.random.normal(k4, (1, C), dtype=jnp.float32) * 0.1

    out = jax.block_until_ready(channel_gate(x, w1, b1, w2, b2))
    ref = jax.block_until_ready(channel_gate_ref(x, w1, b1, w2, b2))

    assert out.shape == (B, C, H, W)
    assert jnp.allclose(out, ref, atol=1e-5, rtol=1e-5), "mismatch vs reference"

    print("KERNEL_OK")
</pallas_src>

<mosaic_0001>
module attributes {stable_mosaic.version = 11 : i64} {
  func.func @channel_gate_kernel(%arg0: i32, %arg1: memref<1x32x256xf32, #tpu.memory_space<vmem>>, %arg2: memref<2x32xf32, #tpu.memory_space<vmem>>, %arg3: memref<2x1xf32, #tpu.memory_space<vmem>>, %arg4: memref<32x2xf32, #tpu.memory_space<vmem>>, %arg5: memref<32x1xf32, #tpu.memory_space<vmem>>, %arg6: memref<1x32x256xf32, #tpu.memory_space<vmem>>) attributes {dimension_semantics = [#tpu.dimension_semantics<parallel>], iteration_bounds = array<i64: 2>, scalar_prefetch = 0 : i64, scratch_operands = 0 : i64, tpu.core_type = #tpu.core_type<tc>, window_params = [{transform_indices = @transform_0, window_bounds = array<i64: 1, 32, 256>}, {pipeline_mode = #tpu.pipeline_mode<synchronous>, transform_indices = @transform_1, window_bounds = array<i64: 2, 32>}, {pipeline_mode = #tpu.pipeline_mode<synchronous>, transform_indices = @transform_2, window_bounds = array<i64: 2, 1>}, {pipeline_mode = #tpu.pipeline_mode<synchronous>, transform_indices = @transform_3, window_bounds = array<i64: 32, 2>}, {pipeline_mode = #tpu.pipeline_mode<synchronous>, transform_indices = @transform_4, window_bounds = array<i64: 32, 1>}, {transform_indices = @transform_5, window_bounds = array<i64: 1, 32, 256>}]} {
    %c0 = arith.constant 0 : index
    %c0_0 = arith.constant 0 : index
    %c0_1 = arith.constant 0 : index
    %0 = vector.load %arg1[%c0, %c0_0, %c0_1] : memref<1x32x256xf32, #tpu.memory_space<vmem>>, vector<1x32x256xf32>
    %1 = vector.shape_cast %0 : vector<1x32x256xf32> to vector<32x256xf32>
    %cst = arith.constant dense<0.000000e+00> : vector<32xf32>
    %2 = vector.multi_reduction <add>, %1, %cst [1] : vector<32x256xf32> to vector<32xf32>
    %3 = vector.shape_cast %2 : vector<32xf32> to vector<32x1xf32>
    %cst_2 = arith.constant 2.560000e+02 : f32
    %4 = vector.broadcast %cst_2 : f32 to vector<32x1xf32>
    %5 = arith.divf %3, %4 : vector<32x1xf32>
    %cst_3 = arith.constant dense<0xFF800000> : vector<32xf32>
    %6 = vector.multi_reduction <maximumf>, %1, %cst_3 [1] : vector<32x256xf32> to vector<32xf32>
    %7 = vector.shape_cast %6 : vector<32xf32> to vector<32x1xf32>
    %8 = tpu.iota {dimensions = array<i32: 1>} : vector<32x2xi32>
    %c0_i32 = arith.constant 0 : i32
    %9 = vector.broadcast %c0_i32 : i32 to vector<32x2xi32>
    %10 = arith.cmpi eq, %8, %9 : vector<32x2xi32>
    %11 = vector.shape_cast %5 : vector<32x1xf32> to vector<32x1xf32>
    %12 = vector.broadcast %11 : vector<32x1xf32> to vector<32x2xf32>
    %13 = vector.shape_cast %7 : vector<32x1xf32> to vector<32x1xf32>
    %14 = vector.broadcast %13 : vector<32x1xf32> to vector<32x2xf32>
    %15 = arith.select %10, %12, %14 : vector<32x2xi1>, vector<32x2xf32>
    %c0_4 = arith.constant 0 : index
    %c0_5 = arith.constant 0 : index
    %16 = vector.load %arg2[%c0_4, %c0_5] : memref<2x32xf32, #tpu.memory_space<vmem>>, vector<2x32xf32>
    %cst_6 = arith.constant dense<0.000000e+00> : vector<2x2xf32>
    %17 = tpu.matmul %16, %15, %cst_6 {dimension_numbers = #tpu.dot_dimension_numbers<[1], [0], [0], [1], [0, 0, 1, 1], [], []>} : vector<2x32xf32>, vector<32x2xf32>, vector<2x2xf32> -> vector<2x2xf32>
    %c0_7 = arith.constant 0 : index
    %c0_8 = arith.constant 0 : index
    %18 = vector.load %arg3[%c0_7, %c0_8] : memref<2x1xf32, #tpu.memory_space<vmem>>, vector<2x1xf32>
    %19 = vector.broadcast %18 : vector<2x1xf32> to vector<2x2xf32>
    %20 = arith.addf %17, %19 : vector<2x2xf32>
    %cst_9 = arith.constant 0.000000e+00 : f32
    %21 = vector.broadcast %cst_9 : f32 to vector<2x2xf32>
    %22 = arith.maximumf %20, %21 : vector<2x2xf32>
    %c0_10 = arith.constant 0 : index
    %c0_11 = arith.constant 0 : index
    %23 = vector.load %arg4[%c0_10, %c0_11] : memref<32x2xf32, #tpu.memory_space<vmem>>, vector<32x2xf32>
    %cst_12 = arith.constant dense<0.000000e+00> : vector<32x2xf32>
    %24 = tpu.matmul %23, %22, %cst_12 {dimension_numbers = #tpu.dot_dimension_numbers<[1], [0], [0], [1], [0, 0, 1, 1], [], []>} : vector<32x2xf32>, vector<2x2xf32>, vector<32x2xf32> -> vector<32x2xf32>
    %c0_13 = arith.constant 0 : index
    %c0_14 = arith.constant 0 : index
    %25 = vector.load %arg5[%c0_13, %c0_14] : memref<32x1xf32, #tpu.memory_space<vmem>>, vector<32x1xf32>
    %26 = vector.broadcast %25 : vector<32x1xf32> to vector<32x2xf32>
    %27 = arith.addf %24, %26 : vector<32x2xf32>
    %cst_15 = arith.constant dense<0.000000e+00> : vector<32xf32>
    %28 = vector.multi_reduction <add>, %27, %cst_15 [1] : vector<32x2xf32> to vector<32xf32>
    %29 = vector.shape_cast %28 : vector<32xf32> to vector<32x1xf32>
    %30 = arith.negf %29 : vector<32x1xf32>
    %31 = math.exp %30 : vector<32x1xf32>
    %cst_16 = arith.constant 1.000000e+00 : f32
    %32 = vector.broadcast %cst_16 : f32 to vector<32x1xf32>
    %33 = arith.addf %32, %31 : vector<32x1xf32>
    %34 = arith.divf %32, %33 : vector<32x1xf32>
    %35 = vector.broadcast %34 : vector<32x1xf32> to vector<32x256xf32>
    %36 = arith.mulf %1, %35 : vector<32x256xf32>
    %c0_17 = arith.constant 0 : index
    %c0_18 = arith.constant 0 : index
    %c0_19 = arith.constant 0 : index
    %37 = vector.load %arg6[%c0_17, %c0_18, %c0_19] : memref<1x32x256xf32, #tpu.memory_space<vmem>>, vector<1x32x256xf32>
    %38 = vector.shape_cast %37 : vector<1x32x256xf32> to vector<32x256xf32>
    %39 = vector.shape_cast %36 : vector<32x256xf32> to vector<1x32x256xf32>
    tpu.vector_store %arg6[%c0_17, %c0_18, %c0_19], %39 {strides = array<i32>} : memref<1x32x256xf32, #tpu.memory_space<vmem>>, vector<1x32x256xf32>,
    return
  }
  func.func @transform_0(%arg0: i32) -> (i32, i32, i32) {
    %c0_i32 = arith.constant 0 : i32
    %c0_i32_0 = arith.constant 0 : i32
    %c0_i32_1 = arith.constant 0 : i32
    return %arg0, %c0_i32, %c0_i32_0 : i32, i32, i32
  }
  func.func @transform_1(%arg0: i32) -> (i32, i32) {
    %c0_i32 = arith.constant 0 : i32
    %c0_i32_0 = arith.constant 0 : i32
    %c0_i32_1 = arith.constant 0 : i32
    return %c0_i32, %c0_i32_0 : i32, i32
  }
  func.func @transform_2(%arg0: i32) -> (i32, i32) {
    %c0_i32 = arith.constant 0 : i32
    %c0_i32_0 = arith.constant 0 : i32
    %c0_i32_1 = arith.constant 0 : i32
    return %c0_i32, %c0_i32_0 : i32, i32
  }
  func.func @transform_3(%arg0: i32) -> (i32, i32) {
    %c0_i32 = arith.constant 0 : i32
    %c0_i32_0 = arith.constant 0 : i32
    %c0_i32_1 = arith.constant 0 : i32
    return %c0_i32, %c0_i32_0 : i32, i32
  }
  func.func @transform_4(%arg0: i32) -> (i32, i32) {
    %c0_i32 = arith.constant 0 : i32
    %c0_i32_0 = arith.constant 0 : i32
    %c0_i32_1 = arith.constant 0 : i32
    return %c0_i32, %c0_i32_0 : i32, i32
  }
  func.func @transform_5(%arg0: i32) -> (i32, i32, i32) {
    %c0_i32 = arith.constant 0 : i32
    %c0_i32_0 = arith.constant 0 : i32
    %c0_i32_1 = arith.constant 0 : i32
    return %arg0, %c0_i32, %c0_i32_0 : i32, i32, i32
  }
}

</mosaic_0001>

<bundles_post_ra>
// kernel: tpu_custom_call.1
= control target key start
LH: loop header
LB: loop body
LE: loop exit
PB: predicated region body
PF: predicated region fallthrough
CT: control target
= control target key end

     0   :  { %10 = vsyncpa [#allocation3], 0  ;;  %s1153_s0 = inlined_call_operand.hbm [shape: f32[2,32,256], index: 0, kind: input, shape index: {}]   ;;  %s1154_s1 = inlined_call_operand.vmem [shape: f32[2,32], index: 1, kind: input, shape index: {}]   ;;  %s1155_s2 = inlined_call_operand.vmem [shape: f32[2,1], index: 2, kind: input, shape index: {}]   ;;  %s1156_s3 = inlined_call_operand.vmem [shape: f32[32,2], index: 3, kind: input, shape index: {}]   ;;  %s1157_s4 = inlined_call_operand.vmem [shape: f32[32,1], index: 4, kind: input, shape index: {}]   ;;  %s1158_s5 = inlined_call_operand.hbm [shape: f32[2,32,256], index: 5, kind: output, shape index: {}]  }
   0x1   :  { %12 = vsyncpa [#allocation3 + $0x1], 0 }
   0x2   :  { %13 = vsyncpa [#allocation4], 0 }
   0x3   :  { %15 = vsyncpa [#allocation4 + $0x1], 0  ;;  %s909_s18 = smov 0   ;;  %s911_s19 = smov 0  }
   0x4   :  { %s913_s20 = smov 0   ;;  %s915_s21 = smov 0  }
   0x5 LB: > { %s930_s22 = sadd.s32 4294967295, %s867_s21   ;;  %s638_s23 = sadd.s32 4294967294, %s867_s21   ;;  %s867_s21 = sphi %s915_s21, %s1171_s21   ;;  %s863_s20 = sphi %s913_s20, %s1170_s20   ;;  %s859_s19 = sphi %s911_s19, %s1169_s19   ;;  %s855_s18 = sphi %s909_s18, %s1168_s18  }
   0x6   : > { %s934_s24 = sadd.s32 1, %s867_s21   ;;  %s28_s25 = sadd.s32 1, %s863_s20 }
   0x7   : > { %s25_s26 = ssub.s32 %s867_s21, %s934_s24  ;;  %p35_p0 = scmp.ne.s32.totalorder %s863_s20, %s859_s19 }
   0x8   : > { %p26_p1 = scmp.eq.s32.totalorder %s25_s26, 0  ;;  %p36_p2 = scmp.eq.s32.totalorder %s867_s21, 0 }
   0x9   : > { %p41_p3 = scmp.ne.s32.totalorder %s859_s19, %s855_s18  ;;  %p42_p4 = scmp.eq.s32.totalorder %s930_s22, 0 }
   0xa   : > { %s946_s27 = scalar_select %p26_p1, %s863_s20, %s28_s25  }
   0xb   : > { %p948_p5 = por %p36_p2, %p35_p0  ;;  %p952_p6 = por %p42_p4, %p41_p3 }
   0xc   : > { %p149_p7 = scmp.eq.s32.totalorder %s930_s22, 1  ;;  %p155_p8 = scmp.eq.s32.totalorder %s638_s23, 1 }
   0xd   : > { %p711_p10 = scmp.lt.s32.totalorder %s867_s21, 2  ;;  %s187_s7 = sand.u32 1, %s863_s20  }
   0xe   : > { %p959_p11 = por %p149_p7, %p35_p0  ;;  %p963_p12 = por %p155_p8, %p41_p3 }
   0xf   : > { %s662_s8 = sshll.u32 %s867_s21, 10  ;;  %s641_s9 = sshll.u32 %s187_s7, 6 }
  0x10   : > { %s1162_s30 = scalar_select %p959_p11, 1, 0 }
  0x11   : > { %s1163_s6 = scalar_select %p963_p12, 1, 0 }
  0x12   : > { %s972_s12 = scalar_lea.hbm %s1153_s0, %s662_s8  ;;  %s191_s13 = scalar_lea.vmem [#allocation2], %s641_s9 }
  0x13   : > { %s198_s14 = sshll.u32 %s191_s13, 4  ;;  %p976_p13 = pnand %p711_p10, %p948_p5  ;;  %s980_s14 = int_to_ptr.vmem [resolvable:$true] %s198_s14 }
  0x14   : > { %s982_s16 = scalar_lea.sflag [#allocation3], %s187_s7  ;;  %s771_s17 = scalar_lea.hbm %s972_s12, 1024 }
  0x15   : > { %p772_p0 = scmp.ne.s32.totalorder %s972_s12, %s771_s17  ;;  %p773_p1 = pneg %p976_p13 }
  0x16   : > { %s776_s26 = scalar_lea.hbm %s1153_s0, 2048  ;;  %p777_p4 = scmp.lt.u32.totalorder %s972_s12, %s1153_s0 }
  0x17   : > { %p774_p2 = pnand %p773_p1, %p772_p0  ;;  %p778_p5 = scmp.lt.u32.totalorder %s776_s26, %s771_s17 }
  0x18   : > { %p780_p8 = scmp.lt.u32.totalorder %s771_s17, %s972_s12 }
  0x19   : > { %p775_p3 = pneg %p774_p2  ;;  %p779_p7 = por %p778_p5, %p777_p4 }
  0x1b   : > { %p781_p10 = por %p780_p8, %p779_p7 }
  0x1d   : > { %p782_p9 = pnand %p781_p10, %p775_p3 }
  0x1f   : > { %785 = shalt.err (!%p782_p9)
}
  0x20   : > { %s786_s7 = scalar_lea.vmem %s980_s14, 1024  ;;  %s869_s9 = smov [#allocation2]  }
  0x21   : > { %p787_p0 = scmp.ne.s32.totalorder %s980_s14, %s786_s7  ;;  %s791_s10 = sshll.u32 %s869_s9, 4  ;;  %s792_s10 = int_to_ptr.vmem [resolvable:$false] %s791_s10 }
  0x22   : > { %s793_s11 = scalar_lea.vmem %s792_s10, 2048  ;;  %p794_p11 = scmp.lt.s32.totalorder %s980_s14, %s792_s10 }
  0x23   : > { %p789_p2 = pnand %p787_p0, %p773_p1  ;;  %p795_p4 = scmp.lt.s32.totalorder %s793_s11, %s786_s7 }
  0x25   : > { %p790_p12 = pneg %p789_p2  ;;  %p796_p5 = por %p795_p4, %p794_p11 }
  0x27   : > { %p797_p7 = pnand %p796_p5, %p790_p12 }
  0x29   : > { %800 = shalt.err (!%p797_p7)
}
  0x2a   : > { %s870_s13 = smov 256   ;;  %s871_s17 = smov 16  }
  0x2b   : > { %706 = dma.hbm_to_vmem [thread:$0]  (!%p976_p13), %s972_s12, 1024, %s980_s14, %s982_s16, %s870_s13, %s870_s13, %s871_s17  }
  0x2c   : > { %p644_p9 = scmp.ge.s32.totalorder %s867_s21, 1  ;;  %p206_p1 = scmp.lt.s32.totalorder %s867_s21, 3 }
  0x2e   : > { %p207_p3 = pnand %p644_p9, %p206_p1 }
  0x2f   : > { %s1013_s23 = sand.u32 (!%p207_p3), 1, %s859_s19  }
  0x30   : > { %210 = sbr.rel (%p207_p3) target bundleno = 846 (0x34e), region = 40  ;;  %s645_s25 = sshll.u32 (!%p207_p3), %s1013_s23, 6 }
  0x31   : > { %s213_s26 = scalar_lea.sflag (!%p207_p3), [#allocation3], %s1013_s23  ;;  %s216_s28 = scalar_lea.vmem (!%p207_p3), [#allocation2], %s645_s25 }
  0x37   : > { %846 = dma.done.wait (%p952_p6), %s213_s26, 1024  }
  0x38   : > { %848 = vsyncadd (%p952_p6), %s213_s26, 4294966272  ;;  %v1023_v0 = vld [vmem:[%s216_s28] sm:$0xff]  ;;  %v1025_v1 = vld [vmem:[%s216_s28 + $0x8] sm:$0xff]  ;;  %v872_v16 = vmov 0.0|0.0   ;;  %vm873_vm0 = vmmov 0   ;;  %v874_v17 = vmov 0.0   ;;  %v280_v20 = vlaneseq }
  0x39   : > { %v1027_v2 = vld [vmem:[%s216_s28 + $0x10] sm:$0xff]  ;;  %v268_v3 = vmax.f32 %v1023_v0, %v1025_v1  ;;  %v251_v4 = vadd.f32 %v1025_v1, %v1023_v0  ;;  %v1033_v5 = vld [vmem:[%s216_s28 + $0x18] sm:$0xff]  ;;  %v1043_v10 = vld [vmem:[%s216_s28 + $0x20] sm:$0xff]  ;;  %693 = vmatprep.subr.bf16.mxu0 %v872_v16  ;;  %682 = vmatprep.mubr.msk.f32.mxu0 %vm873_vm0, %v874_v17  ;;  %v875_v19 = vmov 0   ;;  %vm294_vm2 = vcmask 261120   ;;  %s242_s7 = scalar_lea.vmem [#allocation5], %s645_s25 }
  0x3a   : > { %v271_v6 = vmax.f32 %v1027_v2, %v1033_v5  ;;  %v254_v7 = vadd.f32 %v1033_v5, %v1027_v2  ;;  %v1039_v8 = vld [vmem:[%s216_s28 + $0x30] sm:$0xff]  ;;  %v1041_v9 = vld [vmem:[%s216_s28 + $0x38] sm:$0xff]  ;;  %v1045_v11 = vld [vmem:[%s216_s28 + $0x28] sm:$0xff]  ;;  %753 = vset.pattern.permute.xlu0 %v875_v19  ;;  %754 = vset.pattern.permute.xlu1 %v875_v19  ;;  %v281_v23 = vand.u32 127, %v280_v20  ;;  %vm397_vm3 = vcmask 15360   ;;  %s663_s9 = sshll.u32 %s930_s22, 10 }
  0x3b   : > { %269 = vmax.xlane.f32.xlu1 %v268_v3  ;;  %252 = vadd.xlane.f32.xlu0 %v251_v4  ;;  %v260_v12 = vadd.f32 %v1041_v9, %v1039_v8  ;;  %v257_v13 = vadd.f32 %v1045_v11, %v1043_v10  ;;  %v277_v14 = vmax.f32 %v1039_v8, %v1041_v9  ;;  %v288_v18 = vld [vmem:[%s1155_s2] sm:$0x3]  ;;  %v374_v43 = vld [vmem:[%s1157_s4 + $0x8] sm:$0xff]  ;;  %v375_v44 = vld [vmem:[%s1157_s4 + $0x10] sm:$0xff]  ;;  %vm410_vm4 = vcmask 1041408   ;;  %s565_s10 = sshll.u32 %s242_s7, 4  ;;  %s1105_s25 = scalar_lea.hbm %s1158_s5, %s663_s9  ;;  %s1107_s10 = int_to_ptr.vmem [resolvable:$true] %s565_s10 }
  0x3c   : > { %v274_v15 = vmax.f32 %v1043_v10, %v1045_v11  ;;  %vm282_vm1 = vcmp.eq.s32.totalorder %v281_v23, 0  ;;  %v287_v40 = vld [vmem:[%s1154_s1] sm:$0x3]  ;;  %v376_v45 = vld [vmem:[%s1157_s4 + $0x18] sm:$0xff]  ;;  %v370_v51 = vld [vmem:[%s1156_s3 + $0x8] sm:$0xff]  ;;  %s552_s22 = scalar_lea.sflag [#allocation4], %s1013_s23 }
  0x3d   : > { %v369_v41 = vld [vmem:[%s1156_s3] sm:$0xff]  ;;  %v371_v52 = vld [vmem:[%s1156_s3 + $0x10] sm:$0xff]  ;;  %v372_v53 = vld [vmem:[%s1156_s3 + $0x18] sm:$0xff]  ;;  %s801_s17 = scalar_lea.vmem %s1107_s10, 1024  ;;  %p1165_p11 = scmp.ne.s32.totalorder %s1162_s30, 0 }
  0x3e   : > { %687 = vmatprep.mubr.msk.f32.mxu1 %vm397_vm3, %v369_v41  ;;  %v373_v42 = vld [vmem:[%s1157_s4] sm:$0xff]  ;;  %p802_p6 = scmp.ne.s32.totalorder %s1107_s10, %s801_s17  ;;  %s876_s26 = smov [#allocation5]  }
  0x3f   : > { %272 = vmax.xlane.f32.xlu1 %v271_v6  ;;  %255 = vadd.xlane.f32.xlu0 %v254_v7  ;;  %s805_s28 = sshll.u32 %s876_s26, 4  ;;  %s806_s28 = int_to_ptr.vmem [resolvable:$false] %s805_s28 }
  0x40   : > { %p803_p12 = pnand %p802_p6, %p1165_p11  ;;  %s807_s29 = scalar_lea.vmem %s806_s28, 2048 }
  0x41   : > { %p808_p8 = scmp.lt.s32.totalorder %s1107_s10, %s806_s28  ;;  %p809_p10 = scmp.lt.s32.totalorder %s807_s29, %s801_s17 }
  0x42   : > { %p804_p13 = pneg %p803_p12 }
  0x43   : > { %261 = vadd.xlane.f32.xlu1 %v260_v12  ;;  %258 = vadd.xlane.f32.xlu0 %v257_v13  ;;  %p810_p0 = por %p809_p10, %p808_p8 }
  0x45   : > { %p811_p2 = pnand %p810_p0, %p804_p13 }
  0x47   : > { %278 = vmax.xlane.f32.xlu1 %v277_v14  ;;  %275 = vmax.xlane.f32.xlu0 %v274_v15 }
  0x58   : > { %379 = vperm.xlu1 %754, %v373_v42  }
  0x5c   : > { %384 = vperm.xlu1 %754, %v374_v43  }
  0x5d   : > { %291 = vperm.xlu0 %753, %v288_v18  }
  0x60   : > { %389 = vperm.xlu1 %754, %v375_v44  }
  0x64   : > { %394 = vperm.xlu1 %754, %v376_v45  }
  0xc8   : > { %v270_v21 = vpop.xlane.xlu1 %269  ;;  %v253_v22 = vpop.xlane.xlu0 %252 }
  0xc9   : > { %v264_v24 = vmul.f32 0.00390625, %v253_v22 }
  0xcb   : > { %v283_v28 = vsel %vm282_vm1, %v264_v24, %v270_v21 }
  0xcc   : > { %v273_v25 = vpop.xlane.xlu1 %272  ;;  %v256_v26 = vpop.xlane.xlu0 %255 }
  0xcd   : > { %v265_v27 = vmul.f32 0.00390625, %v256_v26 }
  0xcf   : > { %v284_v29 = vsel %vm282_vm1, %v265_v27, %v273_v25 }
  0xd0   : > { %v262_v30 = vpop.xlane.xlu1 %261  ;;  %v259_v31 = vpop.xlane.xlu0 %258  ;;  %v694_v32 = vpack.c.bf16 %v284_v29, %v283_v28 }
  0xd1   : > { %v267_v33 = vmul.f32 0.00390625, %v262_v30  ;;  %v266_v34 = vmul.f32 0.00390625, %v259_v31 }
  0xd2   : > { %695 = vmatpush3.bf16.msra.mxu0 %v694_v32 }
  0xd3   : > { %696 = vmatprep.subr.bf16.mxu0 %v872_v16 }
  0xd4   : > { %v279_v35 = vpop.xlane.xlu1 %278  ;;  %v276_v36 = vpop.xlane.xlu0 %275 }
  0xd5   : > { %v286_v37 = vsel %vm282_vm1, %v267_v33, %v279_v35  ;;  %v285_v38 = vsel %vm282_vm1, %v266_v34, %v276_v36 }
  0xd6   : > { %v697_v39 = vpack.c.bf16 %v286_v37, %v285_v38 }
  0xd8   : > { %698 = vmatpush3.bf16.msra.mxu0 %v697_v39  ;;  %v380_v54 = vpop.permute.xlu1 %379 }
  0xdb   : > { %683 = vmatmul.mubr.msk.f32.vlgmr.msra.gmra.mrb[0].mxu0 %vm294_vm2, %v287_v40 }
  0xdc   : > { %v292_v46 = vpop.permute.xlu0 %291  ;;  %v385_v55 = vpop.permute.xlu1 %384 }
  0xe0   : > { %v390_v57 = vpop.permute.xlu1 %389 }
  0xe4   : > { %v395_v6 = vpop.permute.xlu1 %394 }
 0x1ae   : > { %v364_v47 = vpop.f32.mrb[0].mxu0 }
 0x1af   : > { %v365_v48 = vadd.f32 %v364_v47, %v292_v46  ;;  %v684_v49 = vpop.f32.mrb[1].mxu0 }
 0x1b1   : > { %v368_v50 = vmax.f32 %v365_v48, 0.0 }
 0x1b3   : > { %685 = vmatprep.subr.msk.mxu1 %vm410_vm4, %v368_v50 }
 0x1b4   : > { %686 = vmatpush3.msk.msra.mxu1 %vm410_vm4, %v368_v50 }
 0x1b5   : > { %688 = vmatmul.mubr.msk.f32.vlgmr.msra.gmra.mrb[0].mxu1 %vm397_vm3, %v370_v51 }
 0x1b6   : > { %690 = vmatprep.mubr.msk.f32.mxu1 %vm397_vm3, %v371_v52 }
 0x1b9   : > { %691 = vmatmul.mubr.msk.f32.gmra.mrb[2].mxu1 %vm397_vm3, %v372_v53 }
 0x288   : > { %v689_v56 = vpop.f32.mrb[0].mxu1 }
 0x289   : > { %v486_v58 = vadd.f32 %v689_v56, %v385_v55  ;;  %v480_v59 = vpop.f32.mrb[1].mxu1 }
 0x28a   : > { %v481_v60 = vadd.f32 %v480_v59, %v380_v54 }
 0x28b   : > { %v502_v61 = vsel %vm397_vm3, %v486_v58, 0.0 }
 0x28c   : > { %503 = vadd.xlane.f32.xlu0 %v502_v61  ;;  %v692_v62 = vpop.f32.mrb[2].mxu1  ;;  %v499_v63 = vsel %vm397_vm3, %v481_v60, 0.0 }
 0x28d   : > { %v490_v3 = vpop.f32.mrb[3].mxu1  ;;  %500 = vadd.xlane.f32.xlu1 %v499_v63  ;;  %v496_v7 = vadd.f32 %v692_v62, %v395_v6 }
 0x28e   : > { %v491_v4 = vadd.f32 %v490_v3, %v390_v57 }
 0x28f   : > { %v508_v13 = vsel %vm397_vm3, %v496_v7, 0.0 }
 0x290   : > { %v505_v12 = vsel %vm397_vm3, %v491_v4, 0.0 }
 0x291   : > { %506 = vadd.xlane.f32.xlu1 %v505_v12 }
 0x295   : > { %509 = vadd.xlane.f32.xlu1 %v508_v13 }
 0x319   : > { %v504_v14 = vpop.xlane.xlu0 %503 }
 0x31a   : > { %v654_v15 = vmul.f32 -1.442695, %v504_v14  ;;  %v501_v16 = vpop.xlane.xlu1 %500 }
 0x31b   : > { %v653_v17 = vmul.f32 -1.442695, %v501_v16 }
 0x31c   : > { %755 = vpow2.f32 %v654_v15 }
 0x31d   : > { %757 = vpow2.f32 %v653_v17 }
 0x31e   : > { %v507_v18 = vpop.xlane.xlu1 %506 }
 0x31f   : > { %v655_v19 = vmul.f32 -1.442695, %v507_v18 }
 0x321   : > { %759 = vpow2.f32 %v655_v19 }
 0x322   : > { %v510_v20 = vpop.xlane.xlu1 %509 }
 0x323   : > { %v656_v21 = vmul.f32 -1.442695, %v510_v20 }
 0x325   : > { %761 = vpow2.f32 %v656_v21 }
 0x326   : > { %v756_v22 = vpop.eup %755 }
 0x327   : > { %v758_v23 = vpop.eup %757  ;;  %v524_v24 = vadd.f32 1.0, %v756_v22 }
 0x328   : > { %v523_v25 = vadd.f32 1.0, %v758_v23 }
 0x329   : > { %763 = vrcp.f32 %v524_v24 }
 0x32a   : > { %765 = vrcp.f32 %v523_v25 }
 0x32b   : > { %v760_v26 = vpop.eup %759 }
 0x32c   : > { %v525_v27 = vadd.f32 1.0, %v760_v26 }
 0x32e   : > { %767 = vrcp.f32 %v525_v27 }
 0x32f   : > { %v762_v28 = vpop.eup %761 }
 0x330   : > { %v526_v29 = vadd.f32 1.0, %v762_v28 }
 0x332   : > { %769 = vrcp.f32 %v526_v29 }
 0x333   : > { %v764_v30 = vpop.eup %763 }
 0x334   : > { %v766_v31 = vpop.eup %765  ;;  %v537_v32 = vmul.f32 %v764_v30, %v1027_v2  ;;  %v538_v33 = vmul.f32 %v764_v30, %v1033_v5 }
 0x335   : > { %v535_v34 = vmul.f32 %v766_v31, %v1023_v0  ;;  %v536_v35 = vmul.f32 %v766_v31, %v1025_v1 }
 0x336   : > { %545 = vst [vmem:[%s242_s7 + $0x10] sm:$0xff] %v537_v32  ;;  %546 = vst [vmem:[%s242_s7 + $0x18] sm:$0xff] %v538_v33 }
 0x337   : > { %543 = vst [vmem:[%s242_s7] sm:$0xff] %v535_v34  ;;  %544 = vst [vmem:[%s242_s7 + $0x8] sm:$0xff] %v536_v35 }
 0x338   : > { %v768_v36 = vpop.eup %767 }
 0x339   : > { %v539_v37 = vmul.f32 %v768_v36, %v1043_v10  ;;  %v540_v38 = vmul.f32 %v768_v36, %v1045_v11 }
 0x33b   : > { %547 = vst [vmem:[%s242_s7 + $0x20] sm:$0xff] %v539_v37  ;;  %548 = vst [vmem:[%s242_s7 + $0x28] sm:$0xff] %v540_v38 }
 0x33c   : > { %v770_v0 = vpop.eup %769 }
 0x33d   : > { %v541_v1 = vmul.f32 %v770_v0, %v1039_v8  ;;  %v542_v2 = vmul.f32 %v770_v0, %v1041_v9 }
 0x33f   : > { %549 = vst [vmem:[%s242_s7 + $0x30] sm:$0xff] %v541_v1  ;;  %550 = vst [vmem:[%s242_s7 + $0x38] sm:$0xff] %v542_v2 }
 0x340   : > { %814 = shalt.err (!%p811_p2)
}
 0x341   : > { %s815_s12 = scalar_lea.hbm %s1105_s25, 1024  ;;  %s819_s16 = scalar_lea.hbm %s1158_s5, 2048 }
 0x342   : > { %p816_p4 = scmp.ne.s32.totalorder %s1105_s25, %s815_s12  ;;  %p820_p9 = scmp.lt.u32.totalorder %s1105_s25, %s1158_s5 }
 0x343   : > { %p821_p1 = scmp.lt.u32.totalorder %s819_s16, %s815_s12  ;;  %p823_p6 = scmp.lt.u32.totalorder %s815_s12, %s1105_s25 }
 0x344   : > { %p817_p5 = pnand %p816_p4, %p1165_p11 }
 0x345   : > { %p822_p3 = por %p821_p1, %p820_p9 }
 0x346   : > { %p818_p7 = pneg %p817_p5 }
 0x347   : > { %p824_p12 = por %p823_p6, %p822_p3 }
 0x349   : > { %p825_p13 = pnand %p824_p12, %p818_p7 }
 0x34b   : > { %828 = shalt.err (!%p825_p13)
}
 0x34c   : > { %s877_s9 = smov 256   ;;  %s878_s11 = smov 16  }
 0x34d   : > { %701 = dma.vmem_to_hbm [thread:$0]  (%p1165_p11), %s1107_s10, 1024, %s1105_s25, %s552_s22, %s877_s9, %s877_s9, %s878_s11  }
 0x34e PF: > { %s580_s13 = sand.u32 1, %s855_s18   ;;  %p1166_p8 = scmp.ne.s32.totalorder %s1163_s6, 0 }
 0x34f   : > { %p1167_p10 = scmp.ge.s32.totalorder %s867_s21, 2  ;;  %s581_s17 = scalar_lea.sflag [#allocation4], %s580_s13 }
 0x351   : > { %p708_p0 = pnand %p1167_p10, %p1166_p8 }
 0x353   : > { %850 = dma.done.wait (!%p708_p0), %s581_s17, 1024  }
 0x354   : > { %852 = vsyncadd (!%p708_p0), %s581_s17, 4294966272  ;;  %p18_p2 = scmp.ge.s32.totalorder %s934_s24, 4   ;;  %s1168_s18 = smov %s859_s19 }
 0x355   : > { %s1169_s19 = smov %s863_s20  ;;  %s1170_s20 = smov %s946_s27 }
 0x356   : > { %s1171_s21 = smov %s934_s24  ;;  %20 = sbr.rel (!%p18_p2) target bundleno = 5 (0x5), region = 85 }
 0x35d   :  { %586 = vsyncpa [#allocation3], 1 }
 0x35e   :  { %588 = vsyncpa [#allocation3 + $0x1], 1 }
 0x35f   :  { %589 = vsyncpa [#allocation4], 1 }
 0x360   :  { %591 = vsyncpa [#allocation4 + $0x1], 1 }

</bundles_post_ra>
